<compile_context>
chip_gen: v7x
topology: tpu7x:2x2x1
jax: 0.10.0
libtpu: 0.0.40
codegen_flags: <defaults>
</compile_context>

<pallas_src>
import jax
import jax.numpy as jnp
import numpy as np
from jax.experimental import pallas as pl
from jax.experimental.pallas import tpu as pltpu


LEAKY_SLOPE = 0.01   # nn.LeakyReLU default
BN_EPS = 1e-5        # nn.BatchNorm1d default
_LANE = 128


def _round_up(x, m):
    return ((x + m - 1) // m) * m


_VMEM_CAP_CACHE = [None]


def _vmem_capacity_bytes():
    """Physical VMEM per core; conservative 64 MiB fallback if the query fails."""
    if _VMEM_CAP_CACHE[0] is None:
        try:
            info = pltpu.get_tpu_info()
            cap = int(getattr(info, "vmem_capacity_bytes", 64 * 1024 * 1024))
        except Exception:
            cap = 64 * 1024 * 1024
        _VMEM_CAP_CACHE[0] = cap
    return _VMEM_CAP_CACHE[0]


# ---------------------------------------------------------------------------
# Kernels
# ---------------------------------------------------------------------------
def _make_layer_kernel(prenorm, need_mask, tile_b, batch_true):
    """One hidden layer step for one batch tile.

    prenorm=False (first layer): z = x @ W
    prenorm=True:                h = LeakyReLU(z_prev * scale + shift); z = h @ W
    Always emits per-tile BatchNorm partials (sum, sumsq) of z.
    """

    def kernel(*refs):
        if prenorm:
            a_ref, scale_ref, shift_ref, w_ref, z_ref, s_ref, ss_ref = refs
        else:
            a_ref, w_ref, z_ref, s_ref, ss_ref = refs

        if prenorm:
            # Previous layer's BN folded to a single scale/shift, then LeakyReLU
            # as mul + max (2 VALU ops).
            h = a_ref[...].astype(jnp.float32) * scale_ref[...] + shift_ref[...]
            h = jnp.maximum(h, LEAKY_SLOPE * h)
            if need_mask:
                # Zero padded batch rows so they contribute nothing to this
                # layer's BatchNorm statistics.
                row = (pl.program_id(0) * tile_b
                       + jax.lax.broadcasted_iota(jnp.int32, (tile_b, 1), 0))
                h = jnp.where(row < batch_true, h, jnp.zeros_like(h))
            h16 = h.astype(jnp.bfloat16)
        else:
            # First layer: the (zero-padded, bf16) input goes straight to the MXU.
            h16 = a_ref[...]

        # Linear (bias dropped — cancelled by training-mode BN mean subtraction).
        z = jnp.dot(h16, w_ref[...], preferred_element_type=jnp.float32)
        z_ref[...] = z.astype(jnp.bfloat16)

        # Per-tile BatchNorm partial statistics (reduced across tiles in JAX).
        s_ref[...] = jnp.sum(z, axis=0, keepdims=True)[None]        # (1,1,out)
        ss_ref[...] = jnp.sum(z * z, axis=0, keepdims=True)[None]   # (1,1,out)

    return kernel


def _make_predict_kernel(tile_b):
    """Final layer for one batch tile: BN + LeakyReLU of the last hidden z, then
    predict Linear(·, 1) + bias + LeakyReLU, written lane-dense as (1,1,TILE_B)."""

    def kernel(z_ref, scale_ref, shift_ref, w_ref, b_ref, o_ref):
        h = z_ref[...].astype(jnp.float32) * scale_ref[...] + shift_ref[...]
        h = jnp.maximum(h, LEAKY_SLOPE * h)                          # (tile_b, P)
        # out_features == 1: VPU multiply + XLU sublane reduction on h^T so the
        # result lands lane-dense (full-width store, no masked vst on a 1-wide dim).
        ht = h.T                                                     # (P, tile_b)
        o = jnp.sum(ht * w_ref[...], axis=0, keepdims=True) + b_ref[...]  # (1,tile_b)
        o = jnp.maximum(o, LEAKY_SLOPE * o)
        o_ref[...] = o[None]                                         # (1,1,tile_b)

    return kernel


# ---------------------------------------------------------------------------
# Wrapper
# ---------------------------------------------------------------------------
def mlp_forward_pallas(vector, mlp_params, predict_w_row, predict_b):
    """vector: (B, num_factor * 2**(num_layer-1)) float32.
    mlp_params: list of (W_t (in,out), b (1,out), gamma (1,out), beta (1,out)).
                Hidden-layer bias `b` is ignored (cancelled by training-mode BN).
    predict_w_row: (1, num_factor).  predict_b: (1, 1).
    Returns (B,) float32 — matches output_MLP.view(-1)."""
    batch, in0 = vector.shape
    num_hidden = len(mlp_params)
    assert num_hidden >= 1
    assert mlp_params[0][0].shape[0] == in0

    cap = _vmem_capacity_bytes()
    # Generation-aware batch tile: 128 MiB VMEM chips (v5e/v6e) take 256-row
    # tiles (fills the v6e 256-wide MXU M dim); 64 MiB (v7x) takes 128.
    target_tile_b = 256 if cap >= 96 * 2**20 else 128
    tile_b = min(target_tile_b, _round_up(batch, 16))   # multiple of 16 (bf16 pack)
    b_pad = _round_up(batch, tile_b)
    num_tiles = b_pad // tile_b
    need_mask = b_pad != batch

    # Lane-aligned (128) padded widths per layer.
    in_pads = [_round_up(w_t.shape[0], _LANE) for (w_t, _b, _g, _bt) in mlp_params]
    out_pads = [_round_up(w_t.shape[1], _LANE) for (w_t, _b, _g, _bt) in mlp_params]
    last_pad = out_pads[-1]
    pf = predict_w_row.shape[1]
    assert pf == mlp_params[-1][0].shape[1]

    # Scoped-VMEM budget from PEAK live bytes of the worst single call, clamped
    # at 75% of the physical capacity (≈48 MiB v7x, ≈96 MiB v5e/v6e).
    worst = 0
    for ip, op in list(zip(in_pads, out_pads)) + [(last_pad, _LANE)]:
        est = (ip * op * 2                       # resident bf16 weight
               + 2 * tile_b * ip * 2             # double-buffered bf16 activation in
               + 2 * tile_b * op * 2             # double-buffered bf16 z out
               + 2 * 2 * op * 4                  # double-buffered stats outputs
               + 2 * ip * 4                      # resident scale/shift
               + 4 * tile_b * max(ip, op) * 4)   # live f32 slabs (z, h, temporaries)
        worst = max(worst, est)
    vmem_limit = int(min(max(2 * worst, 16 * 2**20), int(0.75 * cap)))
    cparams = pltpu.CompilerParams(
        dimension_semantics=("parallel",), vmem_limit_bytes=vmem_limit)

    # Zero-pad the input (batch rows and feature lanes) and cast to bf16.
    z = jnp.pad(vector.astype(jnp.bfloat16),
                ((0, b_pad - batch), (0, in_pads[0] - in0)))

    scale = shift = None
    for li, (w_t, _b, gamma, beta) in enumerate(mlp_params):
        in_f, out_f = w_t.shape
        ip, op = in_pads[li], out_pads[li]

        w_pad = jnp.pad(w_t, ((0, ip - in_f), (0, op - out_f))).astype(jnp.bfloat16)
        # Zero gamma/beta on padded lanes => scale = shift = 0 there, so padded
        # lanes stay exactly 0 through BN + LeakyReLU.
        gamma_pad = jnp.pad(gamma.reshape(-1).astype(jnp.float32), (0, op - out_f))
        beta_pad = jnp.pad(beta.reshape(-1).astype(jnp.float32), (0, op - out_f))

        prenorm = li > 0
        kernel = _make_layer_kernel(prenorm, need_mask, tile_b, batch)

        in_arrays = [z]
        in_specs = [pl.BlockSpec((tile_b, ip), lambda i: (i, 0))]
        if prenorm:
            in_arrays += [scale, shift]
            in_specs += [pl.BlockSpec((1, ip), lambda i: (0, 0)),
                         pl.BlockSpec((1, ip), lambda i: (0, 0))]
        in_arrays.append(w_pad)
        in_specs.append(pl.BlockSpec((ip, op), lambda i: (0, 0)))   # resident weight

        z, s_part, ss_part = pl.pallas_call(
            kernel,
            grid=(num_tiles,),
            in_specs=in_specs,
            out_specs=[pl.BlockSpec((tile_b, op), lambda i: (i, 0)),
                       pl.BlockSpec((1, 1, op), lambda i: (i, 0, 0)),
                       pl.BlockSpec((1, 1, op), lambda i: (i, 0, 0))],
            out_shape=(jax.ShapeDtypeStruct((b_pad, op), jnp.bfloat16),
                       jax.ShapeDtypeStruct((num_tiles, 1, op), jnp.float32),
                       jax.ShapeDtypeStruct((num_tiles, 1, op), jnp.float32)),
            compiler_params=cparams,
        )(*in_arrays)

        # Tiny two-pass BN fold (full-batch statistics) -> scale/shift for the
        # next kernel.  Padded rows/lanes contribute exactly 0 to both sums.
        s_tot = jnp.sum(s_part, axis=(0, 1))
        ss_tot = jnp.sum(ss_part, axis=(0, 1))
        mean = s_tot / batch
        var = jnp.maximum(ss_tot / batch - mean * mean, 0.0)
        scale_v = gamma_pad * jax.lax.rsqrt(var + BN_EPS)
        shift_v = beta_pad - mean * scale_v
        scale = scale_v.reshape(1, -1)
        shift = shift_v.reshape(1, -1)

    # predict_layer: pad the (1, num_factor) weight row to a (last_pad, 1) column.
    pw_col = jnp.pad(predict_w_row.astype(jnp.float32),
                     ((0, 0), (0, last_pad - pf))).T
    pb = predict_b.astype(jnp.float32).reshape(1, 1)

    out = pl.pallas_call(
        _make_predict_kernel(tile_b),
        grid=(num_tiles,),
        in_specs=[pl.BlockSpec((tile_b, last_pad), lambda i: (i, 0)),
                  pl.BlockSpec((1, last_pad), lambda i: (0, 0)),
                  pl.BlockSpec((1, last_pad), lambda i: (0, 0)),
                  pl.BlockSpec((last_pad, 1), lambda i: (0, 0)),
                  pl.BlockSpec((1, 1), lambda i: (0, 0))],
        out_specs=pl.BlockSpec((1, 1, tile_b), lambda i: (i, 0, 0)),
        out_shape=jax.ShapeDtypeStruct((num_tiles, 1, tile_b), jnp.float32),
        compiler_params=cparams,
    )(z, scale, shift, pw_col, pb)

    return out.reshape(-1)[:batch]   # .view(-1) glue (drops padded rows)


# ---------------------------------------------------------------------------
# Pure-JAX reference (faithful: Linear WITH bias + explicit training-mode BN).
# ---------------------------------------------------------------------------
def mlp_forward_reference(vector, mlp_params, predict_w_row, predict_b):
    h = vector.astype(jnp.float32)
    for (w_t, b, gamma, beta) in mlp_params:
        z = h @ w_t + b
        mean = jnp.mean(z, axis=0, keepdims=True)
        var = jnp.mean((z - mean) ** 2, axis=0, keepdims=True)
        zn = (z - mean) * jax.lax.rsqrt(var + BN_EPS) * gamma + beta
        h = jnp.where(zn > 0, zn, LEAKY_SLOPE * zn)
    o = h @ predict_w_row.T + predict_b
    o = jnp.where(o > 0, o, LEAKY_SLOPE * o)
    return o.reshape(-1)


# ---------------------------------------------------------------------------
# Parameter construction (deterministic, synthetic — mirrors __init__ shapes).
# ---------------------------------------------------------------------------
def init_params(key, *, num_factor, num_layer, num_dayofweek, num_time, num_sex,
                num_age, num_month, num_day, num_destination):
    user_dim = num_factor * 2 ** (num_layer - 2)   # Create_userId output dim
    item_dim = num_factor * 2 ** (num_layer - 2)   # item_embedding dim

    keys = jax.random.split(key, 32)
    k = iter(keys)

    feat_tables = {}
    for name, n in [("dayofweek", num_dayofweek), ("time", num_time),
                    ("sex", num_sex), ("age", num_age),
                    ("month", num_month), ("day", num_day)]:
        feat_tables[name] = 0.1 * jax.random.normal(next(k), (n, user_dim), jnp.float32)

    item_table = 0.1 * jax.random.normal(next(k), (num_destination, item_dim), jnp.float32)

    def kaiming_uniform(key, out_f, in_f):
        bound = jnp.sqrt(6.0 / in_f)
        return jax.random.uniform(key, (out_f, in_f), jnp.float32, -bound, bound)

    def bias_init(key, out_f, in_f):
        bound = 1.0 / jnp.sqrt(in_f)
        return jax.random.uniform(key, (1, out_f), jnp.float32, -bound, bound)

    mlp_params = []
    for i in range(1, num_layer):
        in_f = num_factor * 2 ** (num_layer - i)
        out_f = in_f // 2
        w = kaiming_uniform(next(k), out_f, in_f)        # torch shape (out, in)
        b = bias_init(next(k), out_f, in_f)
        gamma = jnp.ones((1, out_f), jnp.float32)        # BN affine defaults
        beta = jnp.zeros((1, out_f), jnp.float32)
        mlp_params.append((w.T, b, gamma, beta))         # pre-transpose to (in, out)

    pw_row = kaiming_uniform(next(k), 1, num_factor)     # (1, num_factor)
    pb = bias_init(next(k), 1, num_factor)               # (1, 1)

    return feat_tables, item_table, mlp_params, pw_row, pb


def create_user_id(feat_tables, dayofweek, time, sex, age, month, day):
    # Glue: embedding gathers + sum (assumed Create_userId behavior).
    return (feat_tables["dayofweek"][dayofweek]
            + feat_tables["time"][time]
            + feat_tables["sex"][sex]
            + feat_tables["age"][age]
            + feat_tables["month"][month]
            + feat_tables["day"][day])


if __name__ == "__main__":
    num_factor, num_layer = 8, 3
    num_dayofweek, num_time, num_sex = 7, 24, 2
    num_age, num_month, num_day, num_destination = 10, 12, 31, 20
    batch = 8

    key = jax.random.PRNGKey(0)
    pkey, dkey = jax.random.split(key)
    feat_tables, item_table, mlp_params, pw_row, pb = init_params(
        pkey, num_factor=num_factor, num_layer=num_layer,
        num_dayofweek=num_dayofweek, num_time=num_time, num_sex=num_sex,
        num_age=num_age, num_month=num_month, num_day=num_day,
        num_destination=num_destination)

    ks = jax.random.split(dkey, 7)
    dayofweek = jax.random.randint(ks[0], (batch,), 0, num_dayofweek)
    time = jax.random.randint(ks[1], (batch,), 0, num_time)
    sex = jax.random.randint(ks[2], (batch,), 0, num_sex)
    age = jax.random.randint(ks[3], (batch,), 0, num_age)
    month = jax.random.randint(ks[4], (batch,), 0, num_month)
    day = jax.random.randint(ks[5], (batch,), 0, num_day)
    destination = jax.random.randint(ks[6], (batch,), 0, num_destination)

    # Glue: embeddings + concat (matches torch.cat([Create_userId(...), item_emb], -1))
    user_vec = create_user_id(feat_tables, dayofweek, time, sex, age, month, day)
    dest_emb = item_table[destination]
    vector = jnp.concatenate([user_vec, dest_emb], axis=-1)  # (B, num_factor*2**(num_layer-1))

    forward = jax.jit(mlp_forward_pallas)
    out = forward(vector, mlp_params, pw_row, pb)
    jax.block_until_ready(out)

    assert out.shape == (batch,)
    assert bool(jnp.all(jnp.isfinite(out)))

    ref = mlp_forward_reference(vector, mlp_params, pw_row, pb)
    np.testing.assert_allclose(np.asarray(out), np.asarray(ref), rtol=0.1, atol=0.2)

    print("KERNEL_OK")
</pallas_src>

<mosaic_0001>
module attributes {stable_mosaic.version = 11 : i64} {
  func.func @kernel(%arg0: i32, %arg1: memref<16x128xbf16, #tpu.memory_space<vmem>>, %arg2: memref<128x128xbf16, #tpu.memory_space<vmem>>, %arg3: memref<16x128xbf16, #tpu.memory_space<vmem>>, %arg4: memref<1x1x128xf32, #tpu.memory_space<vmem>>, %arg5: memref<1x1x128xf32, #tpu.memory_space<vmem>>) attributes {dimension_semantics = [#tpu.dimension_semantics<parallel>], iteration_bounds = array<i64: 1>, scalar_prefetch = 0 : i64, scratch_operands = 0 : i64, tpu.core_type = #tpu.core_type<tc>, window_params = [{transform_indices = @transform_0, window_bounds = array<i64: 16, 128>}, {pipeline_mode = #tpu.pipeline_mode<synchronous>, transform_indices = @transform_1, window_bounds = array<i64: 128, 128>}, {transform_indices = @transform_2, window_bounds = array<i64: 16, 128>}, {transform_indices = @transform_3, window_bounds = array<i64: 1, 1, 128>}, {transform_indices = @transform_4, window_bounds = array<i64: 1, 1, 128>}]} {
    %c0 = arith.constant 0 : index
    %c0_0 = arith.constant 0 : index
    %0 = vector.load %arg1[%c0, %c0_0] : memref<16x128xbf16, #tpu.memory_space<vmem>>, vector<16x128xbf16>
    %c0_1 = arith.constant 0 : index
    %c0_2 = arith.constant 0 : index
    %1 = vector.load %arg2[%c0_1, %c0_2] : memref<128x128xbf16, #tpu.memory_space<vmem>>, vector<128x128xbf16>
    %cst = arith.constant dense<0.000000e+00> : vector<16x128xf32>
    %2 = tpu.matmul %0, %1, %cst {dimension_numbers = #tpu.dot_dimension_numbers<[1], [0], [0], [1], [0, 0, 1, 1], [], []>} : vector<16x128xbf16>, vector<128x128xbf16>, vector<16x128xf32> -> vector<16x128xf32>
    %3 = arith.truncf %2 : vector<16x128xf32> to vector<16x128xbf16>
    %c0_3 = arith.constant 0 : index
    %c0_4 = arith.constant 0 : index
    %4 = vector.load %arg3[%c0_3, %c0_4] : memref<16x128xbf16, #tpu.memory_space<vmem>>, vector<16x128xbf16>
    tpu.vector_store %arg3[%c0_3, %c0_4], %3 {strides = array<i32>} : memref<16x128xbf16, #tpu.memory_space<vmem>>, vector<16x128xbf16>,
    %cst_5 = arith.constant dense<0.000000e+00> : vector<128xf32>
    %5 = vector.multi_reduction <add>, %2, %cst_5 [0] : vector<16x128xf32> to vector<128xf32>
    %6 = vector.shape_cast %5 : vector<128xf32> to vector<1x128xf32>
    %7 = vector.shape_cast %6 : vector<1x128xf32> to vector<1x1x128xf32>
    %c0_6 = arith.constant 0 : index
    %c0_7 = arith.constant 0 : index
    %c0_8 = arith.constant 0 : index
    %8 = vector.load %arg4[%c0_6, %c0_7, %c0_8] : memref<1x1x128xf32, #tpu.memory_space<vmem>>, vector<1x1x128xf32>
    tpu.vector_store %arg4[%c0_6, %c0_7, %c0_8], %7 {strides = array<i32>} : memref<1x1x128xf32, #tpu.memory_space<vmem>>, vector<1x1x128xf32>,
    %9 = arith.mulf %2, %2 : vector<16x128xf32>
    %cst_9 = arith.constant dense<0.000000e+00> : vector<128xf32>
    %10 = vector.multi_reduction <add>, %9, %cst_9 [0] : vector<16x128xf32> to vector<128xf32>
    %11 = vector.shape_cast %10 : vector<128xf32> to vector<1x128xf32>
    %12 = vector.shape_cast %11 : vector<1x128xf32> to vector<1x1x128xf32>
    %c0_10 = arith.constant 0 : index
    %c0_11 = arith.constant 0 : index
    %c0_12 = arith.constant 0 : index
    %13 = vector.load %arg5[%c0_10, %c0_11, %c0_12] : memref<1x1x128xf32, #tpu.memory_space<vmem>>, vector<1x1x128xf32>
    tpu.vector_store %arg5[%c0_10, %c0_11, %c0_12], %12 {strides = array<i32>} : memref<1x1x128xf32, #tpu.memory_space<vmem>>, vector<1x1x128xf32>,
    return
  }
  func.func @transform_0(%arg0: i32) -> (i32, i32) {
    %c0_i32 = arith.constant 0 : i32
    %c0_i32_0 = arith.constant 0 : i32
    return %arg0, %c0_i32 : i32, i32
  }
  func.func @transform_1(%arg0: i32) -> (i32, i32) {
    %c0_i32 = arith.constant 0 : i32
    %c0_i32_0 = arith.constant 0 : i32
    %c0_i32_1 = arith.constant 0 : i32
    return %c0_i32, %c0_i32_0 : i32, i32
  }
  func.func @transform_2(%arg0: i32) -> (i32, i32) {
    %c0_i32 = arith.constant 0 : i32
    %c0_i32_0 = arith.constant 0 : i32
    return %arg0, %c0_i32 : i32, i32
  }
  func.func @transform_3(%arg0: i32) -> (i32, i32, i32) {
    %c0_i32 = arith.constant 0 : i32
    %c0_i32_0 = arith.constant 0 : i32
    %c0_i32_1 = arith.constant 0 : i32
    return %arg0, %c0_i32, %c0_i32_0 : i32, i32, i32
  }
  func.func @transform_4(%arg0: i32) -> (i32, i32, i32) {
    %c0_i32 = arith.constant 0 : i32
    %c0_i32_0 = arith.constant 0 : i32
    %c0_i32_1 = arith.constant 0 : i32
    return %arg0, %c0_i32, %c0_i32_0 : i32, i32, i32
  }
}

module attributes {stable_mosaic.version = 11 : i64} {
  func.func @kernel(%arg0: i32, %arg1: memref<16x128xbf16, #tpu.memory_space<vmem>>, %arg2: memref<1x128xf32, #tpu.memory_space<vmem>>, %arg3: memref<1x128xf32, #tpu.memory_space<vmem>>, %arg4: memref<128x128xbf16, #tpu.memory_space<vmem>>, %arg5: memref<16x128xbf16, #tpu.memory_space<vmem>>, %arg6: memref<1x1x128xf32, #tpu.memory_space<vmem>>, %arg7: memref<1x1x128xf32, #tpu.memory_space<vmem>>) attributes {dimension_semantics = [#tpu.dimension_semantics<parallel>], iteration_bounds = array<i64: 1>, scalar_prefetch = 0 : i64, scratch_operands = 0 : i64, tpu.core_type = #tpu.core_type<tc>, window_params = [{transform_indices = @transform_0, window_bounds = array<i64: 16, 128>}, {pipeline_mode = #tpu.pipeline_mode<synchronous>, transform_indices = @transform_1, window_bounds = array<i64: 1, 128>}, {pipeline_mode = #tpu.pipeline_mode<synchronous>, transform_indices = @transform_2, window_bounds = array<i64: 1, 128>}, {pipeline_mode = #tpu.pipeline_mode<synchronous>, transform_indices = @transform_3, window_bounds = array<i64: 128, 128>}, {transform_indices = @transform_4, window_bounds = array<i64: 16, 128>}, {transform_indices = @transform_5, window_bounds = array<i64: 1, 1, 128>}, {transform_indices = @transform_6, window_bounds = array<i64: 1, 1, 128>}]} {
    %c0 = arith.constant 0 : index
    %c0_0 = arith.constant 0 : index
    %0 = vector.load %arg1[%c0, %c0_0] : memref<16x128xbf16, #tpu.memory_space<vmem>>, vector<16x128xbf16>
    %1 = arith.extf %0 : vector<16x128xbf16> to vector<16x128xf32>
    %c0_1 = arith.constant 0 : index
    %c0_2 = arith.constant 0 : index
    %2 = vector.load %arg2[%c0_1, %c0_2] : memref<1x128xf32, #tpu.memory_space<vmem>>, vector<1x128xf32>
    %3 = vector.broadcast %2 : vector<1x128xf32> to vector<16x128xf32>
    %4 = arith.mulf %1, %3 : vector<16x128xf32>
    %c0_3 = arith.constant 0 : index
    %c0_4 = arith.constant 0 : index
    %5 = vector.load %arg3[%c0_3, %c0_4] : memref<1x128xf32, #tpu.memory_space<vmem>>, vector<1x128xf32>
    %6 = vector.broadcast %5 : vector<1x128xf32> to vector<16x128xf32>
    %7 = arith.addf %4, %6 : vector<16x128xf32>
    %cst = arith.constant 0.00999999977 : f32
    %8 = vector.broadcast %cst : f32 to vector<16x128xf32>
    %9 = arith.mulf %8, %7 : vector<16x128xf32>
    %10 = arith.maximumf %7, %9 : vector<16x128xf32>
    %c16_i32 = arith.constant 16 : i32
    %11 = arith.muli %arg0, %c16_i32 : i32
    %12 = tpu.iota {dimensions = array<i32: 0>} : vector<16x1xi32>
    %13 = vector.broadcast %11 : i32 to vector<16x1xi32>
    %14 = arith.addi %13, %12 : vector<16x1xi32>
    %c8_i32 = arith.constant 8 : i32
    %15 = vector.broadcast %c8_i32 : i32 to vector<16x1xi32>
    %16 = arith.cmpi slt, %14, %15 : vector<16x1xi32>
    %cst_5 = arith.constant 0.000000e+00 : f32
    %17 = vector.broadcast %cst_5 : f32 to vector<16x128xf32>
    %18 = vector.shape_cast %16 : vector<16x1xi1> to vector<16x1xi1>
    %19 = vector.broadcast %18 : vector<16x1xi1> to vector<16x128xi1>
    %20 = arith.select %19, %10, %17 : vector<16x128xi1>, vector<16x128xf32>
    %21 = arith.truncf %20 : vector<16x128xf32> to vector<16x128xbf16>
    %c0_6 = arith.constant 0 : index
    %c0_7 = arith.constant 0 : index
    %22 = vector.load %arg4[%c0_6, %c0_7] : memref<128x128xbf16, #tpu.memory_space<vmem>>, vector<128x128xbf16>
    %cst_8 = arith.constant dense<0.000000e+00> : vector<16x128xf32>
    %23 = tpu.matmul %21, %22, %cst_8 {dimension_numbers = #tpu.dot_dimension_numbers<[1], [0], [0], [1], [0, 0, 1, 1], [], []>} : vector<16x128xbf16>, vector<128x128xbf16>, vector<16x128xf32> -> vector<16x128xf32>
    %24 = arith.truncf %23 : vector<16x128xf32> to vector<16x128xbf16>
    %c0_9 = arith.constant 0 : index
    %c0_10 = arith.constant 0 : index
    %25 = vector.load %arg5[%c0_9, %c0_10] : memref<16x128xbf16, #tpu.memory_space<vmem>>, vector<16x128xbf16>
    tpu.vector_store %arg5[%c0_9, %c0_10], %24 {strides = array<i32>} : memref<16x128xbf16, #tpu.memory_space<vmem>>, vector<16x128xbf16>,
    %cst_11 = arith.constant dense<0.000000e+00> : vector<128xf32>
    %26 = vector.multi_reduction <add>, %23, %cst_11 [0] : vector<16x128xf32> to vector<128xf32>
    %27 = vector.shape_cast %26 : vector<128xf32> to vector<1x128xf32>
    %28 = vector.shape_cast %27 : vector<1x128xf32> to vector<1x1x128xf32>
    %c0_12 = arith.constant 0 : index
    %c0_13 = arith.constant 0 : index
    %c0_14 = arith.constant 0 : index
    %29 = vector.load %arg6[%c0_12, %c0_13, %c0_14] : memref<1x1x128xf32, #tpu.memory_space<vmem>>, vector<1x1x128xf32>
    tpu.vector_store %arg6[%c0_12, %c0_13, %c0_14], %28 {strides = array<i32>} : memref<1x1x128xf32, #tpu.memory_space<vmem>>, vector<1x1x128xf32>,
    %30 = arith.mulf %23, %23 : vector<16x128xf32>
    %cst_15 = arith.constant dense<0.000000e+00> : vector<128xf32>
    %31 = vector.multi_reduction <add>, %30, %cst_15 [0] : vector<16x128xf32> to vector<128xf32>
    %32 = vector.shape_cast %31 : vector<128xf32> to vector<1x128xf32>
    %33 = vector.shape_cast %32 : vector<1x128xf32> to vector<1x1x128xf32>
    %c0_16 = arith.constant 0 : index
    %c0_17 = arith.constant 0 : index
    %c0_18 = arith.constant 0 : index
    %34 = vector.load %arg7[%c0_16, %c0_17, %c0_18] : memref<1x1x128xf32, #tpu.memory_space<vmem>>, vector<1x1x128xf32>
    tpu.vector_store %arg7[%c0_16, %c0_17, %c0_18], %33 {strides = array<i32>} : memref<1x1x128xf32, #tpu.memory_space<vmem>>, vector<1x1x128xf32>,
    return
  }
  func.func @transform_0(%arg0: i32) -> (i32, i32) {
    %c0_i32 = arith.constant 0 : i32
    %c0_i32_0 = arith.constant 0 : i32
    return %arg0, %c0_i32 : i32, i32
  }
  func.func @transform_1(%arg0: i32) -> (i32, i32) {
    %c0_i32 = arith.constant 0 : i32
    %c0_i32_0 = arith.constant 0 : i32
    %c0_i32_1 = arith.constant 0 : i32
    return %c0_i32, %c0_i32_0 : i32, i32
  }
  func.func @transform_2(%arg0: i32) -> (i32, i32) {
    %c0_i32 = arith.constant 0 : i32
    %c0_i32_0 = arith.constant 0 : i32
    %c0_i32_1 = arith.constant 0 : i32
    return %c0_i32, %c0_i32_0 : i32, i32
  }
  func.func @transform_3(%arg0: i32) -> (i32, i32) {
    %c0_i32 = arith.constant 0 : i32
    %c0_i32_0 = arith.constant 0 : i32
    %c0_i32_1 = arith.constant 0 : i32
    return %c0_i32, %c0_i32_0 : i32, i32
  }
  func.func @transform_4(%arg0: i32) -> (i32, i32) {
    %c0_i32 = arith.constant 0 : i32
    %c0_i32_0 = arith.constant 0 : i32
    return %arg0, %c0_i32 : i32, i32
  }
  func.func @transform_5(%arg0: i32) -> (i32, i32, i32) {
    %c0_i32 = arith.constant 0 : i32
    %c0_i32_0 = arith.constant 0 : i32
    %c0_i32_1 = arith.constant 0 : i32
    return %arg0, %c0_i32, %c0_i32_0 : i32, i32, i32
  }
  func.func @transform_6(%arg0: i32) -> (i32, i32, i32) {
    %c0_i32 = arith.constant 0 : i32
    %c0_i32_0 = arith.constant 0 : i32
    %c0_i32_1 = arith.constant 0 : i32
    return %arg0, %c0_i32, %c0_i32_0 : i32, i32, i32
  }
}

module attributes {stable_mosaic.version = 11 : i64} {
  func.func @kernel(%arg0: i32, %arg1: memref<16x128xbf16, #tpu.memory_space<vmem>>, %arg2: memref<1x128xf32, #tpu.memory_space<vmem>>, %arg3: memref<1x128xf32, #tpu.memory_space<vmem>>, %arg4: memref<128x1xf32, #tpu.memory_space<vmem>>, %arg5: memref<1x1xf32, #tpu.memory_space<vmem>>, %arg6: memref<1x1x16xf32, #tpu.memory_space<vmem>>) attributes {dimension_semantics = [#tpu.dimension_semantics<parallel>], iteration_bounds = array<i64: 1>, scalar_prefetch = 0 : i64, scratch_operands = 0 : i64, tpu.core_type = #tpu.core_type<tc>, window_params = [{transform_indices = @transform_0, window_bounds = array<i64: 16, 128>}, {pipeline_mode = #tpu.pipeline_mode<synchronous>, transform_indices = @transform_1, window_bounds = array<i64: 1, 128>}, {pipeline_mode = #tpu.pipeline_mode<synchronous>, transform_indices = @transform_2, window_bounds = array<i64: 1, 128>}, {pipeline_mode = #tpu.pipeline_mode<synchronous>, transform_indices = @transform_3, window_bounds = array<i64: 128, 1>}, {pipeline_mode = #tpu.pipeline_mode<synchronous>, transform_indices = @transform_4, window_bounds = array<i64: 1, 1>}, {transform_indices = @transform_5, window_bounds = array<i64: 1, 1, 16>}]} {
    %c0 = arith.constant 0 : index
    %c0_0 = arith.constant 0 : index
    %0 = vector.load %arg1[%c0, %c0_0] : memref<16x128xbf16, #tpu.memory_space<vmem>>, vector<16x128xbf16>
    %1 = arith.extf %0 : vector<16x128xbf16> to vector<16x128xf32>
    %c0_1 = arith.constant 0 : index
    %c0_2 = arith.constant 0 : index
    %2 = vector.load %arg2[%c0_1, %c0_2] : memref<1x128xf32, #tpu.memory_space<vmem>>, vector<1x128xf32>
    %3 = vector.broadcast %2 : vector<1x128xf32> to vector<16x128xf32>
    %4 = arith.mulf %1, %3 : vector<16x128xf32>
    %c0_3 = arith.constant 0 : index
    %c0_4 = arith.constant 0 : index
    %5 = vector.load %arg3[%c0_3, %c0_4] : memref<1x128xf32, #tpu.memory_space<vmem>>, vector<1x128xf32>
    %6 = vector.broadcast %5 : vector<1x128xf32> to vector<16x128xf32>
    %7 = arith.addf %4, %6 : vector<16x128xf32>
    %cst = arith.constant 0.00999999977 : f32
    %8 = vector.broadcast %cst : f32 to vector<16x128xf32>
    %9 = arith.mulf %8, %7 : vector<16x128xf32>
    %10 = arith.maximumf %7, %9 : vector<16x128xf32>
    %11 = tpu.transpose %10, [1, 0] : vector<16x128xf32> -> vector<128x16xf32>
    %c0_5 = arith.constant 0 : index
    %c0_6 = arith.constant 0 : index
    %12 = vector.load %arg4[%c0_5, %c0_6] : memref<128x1xf32, #tpu.memory_space<vmem>>, vector<128x1xf32>
    %13 = vector.broadcast %12 : vector<128x1xf32> to vector<128x16xf32>
    %14 = arith.mulf %11, %13 : vector<128x16xf32>
    %cst_7 = arith.constant dense<0.000000e+00> : vector<16xf32>
    %15 = vector.multi_reduction <add>, %14, %cst_7 [0] : vector<128x16xf32> to vector<16xf32>
    %16 = vector.shape_cast %15 : vector<16xf32> to vector<1x16xf32>
    %c0_8 = arith.constant 0 : index
    %c0_9 = arith.constant 0 : index
    %17 = vector.load %arg5[%c0_8, %c0_9] : memref<1x1xf32, #tpu.memory_space<vmem>>, vector<1x1xf32>
    %18 = vector.broadcast %17 : vector<1x1xf32> to vector<1x16xf32>
    %19 = arith.addf %16, %18 : vector<1x16xf32>
    %cst_10 = arith.constant 0.00999999977 : f32
    %20 = vector.broadcast %cst_10 : f32 to vector<1x16xf32>
    %21 = arith.mulf %20, %19 : vector<1x16xf32>
    %22 = arith.maximumf %19, %21 : vector<1x16xf32>
    %23 = vector.shape_cast %22 : vector<1x16xf32> to vector<1x1x16xf32>
    %c0_11 = arith.constant 0 : index
    %c0_12 = arith.constant 0 : index
    %c0_13 = arith.constant 0 : index
    %24 = vector.load %arg6[%c0_11, %c0_12, %c0_13] : memref<1x1x16xf32, #tpu.memory_space<vmem>>, vector<1x1x16xf32>
    tpu.vector_store %arg6[%c0_11, %c0_12, %c0_13], %23 {strides = array<i32>} : memref<1x1x16xf32, #tpu.memory_space<vmem>>, vector<1x1x16xf32>,
    return
  }
  func.func @transform_0(%arg0: i32) -> (i32, i32) {
    %c0_i32 = arith.constant 0 : i32
    %c0_i32_0 = arith.constant 0 : i32
    return %arg0, %c0_i32 : i32, i32
  }
  func.func @transform_1(%arg0: i32) -> (i32, i32) {
    %c0_i32 = arith.constant 0 : i32
    %c0_i32_0 = arith.constant 0 : i32
    %c0_i32_1 = arith.constant 0 : i32
    return %c0_i32, %c0_i32_0 : i32, i32
  }
  func.func @transform_2(%arg0: i32) -> (i32, i32) {
    %c0_i32 = arith.constant 0 : i32
    %c0_i32_0 = arith.constant 0 : i32
    %c0_i32_1 = arith.constant 0 : i32
    return %c0_i32, %c0_i32_0 : i32, i32
  }
  func.func @transform_3(%arg0: i32) -> (i32, i32) {
    %c0_i32 = arith.constant 0 : i32
    %c0_i32_0 = arith.constant 0 : i32
    %c0_i32_1 = arith.constant 0 : i32
    return %c0_i32, %c0_i32_0 : i32, i32
  }
  func.func @transform_4(%arg0: i32) -> (i32, i32) {
    %c0_i32 = arith.constant 0 : i32
    %c0_i32_0 = arith.constant 0 : i32
    %c0_i32_1 = arith.constant 0 : i32
    return %c0_i32, %c0_i32_0 : i32, i32
  }
  func.func @transform_5(%arg0: i32) -> (i32, i32, i32) {
    %c0_i32 = arith.constant 0 : i32
    %c0_i32_0 = arith.constant 0 : i32
    %c0_i32_1 = arith.constant 0 : i32
    return %arg0, %c0_i32, %c0_i32_0 : i32, i32, i32
  }
}

</mosaic_0001>

<bundles_post_ra>
// kernel: mlp_forward_pallas.4
= control target key start
LH: loop header
LB: loop body
LE: loop exit
PB: predicated region body
PF: predicated region fallthrough
CT: control target
= control target key end

     0   :  { %v266_v0 = vmov 0.0   ;;  %vm267_vm0 = vmmov 0   ;;  %s345_s3 = inlined_call_operand.vmem [shape: bf16[128,128], index: 3, kind: input, shape index: {}]   ;;  %s346_s0 = inlined_call_operand.vmem [shape: bf16[16,128], index: 0, kind: input, shape index: {}]   ;;  %s347_s1 = inlined_call_operand.vmem [shape: f32[1,128], index: 1, kind: input, shape index: {}]   ;;  %s348_s2 = inlined_call_operand.vmem [shape: f32[1,128], index: 2, kind: input, shape index: {}]   ;;  %s349_s4 = inlined_call_operand.vmem [shape: bf16[16,128], index: 4, kind: output, shape index: {0}]   ;;  %s350_s5 = inlined_call_operand.vmem [shape: f32[1,1,128], index: 5, kind: output, shape index: {1}]   ;;  %s351_s6 = inlined_call_operand.vmem [shape: f32[1,1,128], index: 6, kind: output, shape index: {2}]  }
   0x1   :  { %236 = vmatprep.subr.bf16.mxu0 %v266_v0  ;;  %v258_v1 = vld [vmem:[%s345_s3] sm:$0xff]   ;;  %252 = vmatprep.mubr.msk.bf16.mxu0 %vm267_vm0, %v266_v0  ;;  %v259_v2 = vld [vmem:[%s345_s3 + $0x8] sm:$0xff]   ;;  %v260_v3 = vld [vmem:[%s345_s3 + $0x10] sm:$0xff]  }
   0x2   :  { %237 = vmatpush3.bf16.msra.mxu0 %v258_v1  ;;  %v21_v4 = vld [vmem:[%s346_s0] sm:$0xf]  ;;  %v261_v6 = vld [vmem:[%s345_s3 + $0x18] sm:$0xff]   ;;  %v263_v12 = vld [vmem:[%s345_s3 + $0x28] sm:$0xff]  }
   0x3   :  { %238 = vmatprep.subr.bf16.mxu0 %v266_v0  ;;  %v23_v5 = vunpack.c.l.bf16 %v21_v4  ;;  %v208_v7 = vld [vmem:[%s347_s1] ss:$0 sm:$0xff]  ;;  %v264_v14 = vld [vmem:[%s345_s3 + $0x30] sm:$0xff]   ;;  %v265_v16 = vld [vmem:[%s345_s3 + $0x38] sm:$0xff]  }
   0x4   :  { %v262_v9 = vld [vmem:[%s345_s3 + $0x20] sm:$0xff]  }
   0x5   :  { %v32_v8 = vmul.f32 %v208_v7, %v23_v5  ;;  %v209_v10 = vld [vmem:[%s348_s2] ss:$0 sm:$0xff] }
   0x6   :  { %239 = vmatpush3.bf16.msra.mxu0 %v259_v2 }
   0x7   :  { %240 = vmatprep.subr.bf16.mxu0 %v266_v0  ;;  %v41_v11 = vadd.f32 %v209_v10, %v32_v8 }
   0x9   :  { %v43_v13 = vmul.f32 0.01, %v41_v11 }
   0xa   :  { %241 = vmatpush3.bf16.msra.mxu0 %v260_v3 }
   0xb   :  { %242 = vmatprep.subr.bf16.mxu0 %v266_v0  ;;  %v45_v15 = vmax.f32 %v41_v11, %v43_v13 }
   0xd   :  { %v62_v17 = vpack.c.bf16 %v266_v0, %v45_v15 }
   0xe   :  { %243 = vmatpush3.bf16.msra.mxu0 %v261_v6 }
   0xf   :  { %244 = vmatprep.subr.bf16.mxu0 %v266_v0 }
  0x12   :  { %245 = vmatpush3.bf16.msra.mxu0 %v262_v9 }
  0x13   :  { %246 = vmatprep.subr.bf16.mxu0 %v266_v0 }
  0x16   :  { %247 = vmatpush3.bf16.msra.mxu0 %v263_v12 }
  0x17   :  { %248 = vmatprep.subr.bf16.mxu0 %v266_v0 }
  0x1a   :  { %249 = vmatpush3.bf16.msra.mxu0 %v264_v14 }
  0x1b   :  { %250 = vmatprep.subr.bf16.mxu0 %v266_v0 }
  0x1e   :  { %251 = vmatpush3.bf16.msra.mxu0 %v265_v16 }
  0x21   :  { %253 = vmatmul.mubr.bf16.vlgmr.msra.gmra.mrb[0].mxu0 %v62_v17 }
  0xf4   :  { %v161_v18 = vpop.f32.mrb[0].mxu0 }
  0xf5   :  { %v254_v19 = vpop.f32.mrb[1].mxu0  ;;  %v186_v21 = vmul.f32 %v161_v18, %v161_v18 }
  0xf6   :  { %v164_v20 = vpop.f32.mrb[2].mxu0 }
  0xf7   :  { %v225_v22 = vpack.c.bf16 %v164_v20, %v161_v18  ;;  %v178_v23 = vadd.f32 %v164_v20, %v161_v18  ;;  %v187_v24 = vmul.f32 %v164_v20, %v164_v20  ;;  %v255_v25 = vpop.f32.mrb[3].mxu0 }
  0xf9   :  { %226 = vst [vmem:[%s349_s4] sm:$0xff] %v225_v22   ;;  %v179_v26 = vrot.slane %v178_v23, 4  ;;  %v188_v27 = vadd.f32 %v187_v24, %v186_v21 }
  0xfb   :  { %v180_v28 = vadd.f32 %v179_v26, %v178_v23  ;;  %v189_v29 = vrot.slane %v188_v27, 4 }
  0xfd   :  { %v181_v30 = vrot.slane %v180_v28, 2  ;;  %v190_v31 = vadd.f32 %v189_v29, %v188_v27 }
  0xff   :  { %v182_v32 = vadd.f32 %v181_v30, %v180_v28  ;;  %v191_v33 = vrot.slane %v190_v31, 2 }
 0x101   :  { %v183_v34 = vrot.slane %v182_v32, 1  ;;  %v192_v35 = vadd.f32 %v191_v33, %v190_v31 }
 0x103   :  { %v184_v36 = vadd.f32 %v183_v34, %v182_v32  ;;  %v193_v37 = vrot.slane %v192_v35, 1 }
 0x105   :  { %185 = vst [vmem:[%s350_s5] sm:$0x1] %v184_v36  ;;  %v194_v38 = vadd.f32 %v193_v37, %v192_v35 }
 0x107   :  { %195 = vst [vmem:[%s351_s6] sm:$0x1] %v194_v38 }

// kernel: mlp_forward_pallas.3
= control target key start
LH: loop header
LB: loop body
LE: loop exit
PB: predicated region body
PF: predicated region fallthrough
CT: control target
= control target key end

     0   :  { %v226_v0 = vmov 0.0   ;;  %vm227_vm0 = vmmov 0   ;;  %s289_s1 = inlined_call_operand.vmem [shape: bf16[128,128], index: 1, kind: input, shape index: {}]   ;;  %s290_s0 = inlined_call_operand.vmem [shape: bf16[16,128], index: 0, kind: input, shape index: {}]   ;;  %s291_s2 = inlined_call_operand.vmem [shape: bf16[16,128], index: 2, kind: output, shape index: {0}]   ;;  %s292_s3 = inlined_call_operand.vmem [shape: f32[1,1,128], index: 3, kind: output, shape index: {1}]   ;;  %s293_s4 = inlined_call_operand.vmem [shape: f32[1,1,128], index: 4, kind: output, shape index: {2}]  }
   0x1   :  { %195 = vmatprep.subr.bf16.mxu0 %v226_v0  ;;  %v217_v1 = vld [vmem:[%s289_s1] sm:$0xff]   ;;  %211 = vmatprep.mubr.msk.bf16.mxu0 %vm227_vm0, %v226_v0  ;;  %v218_v2 = vld [vmem:[%s289_s1 + $0x8] sm:$0xff]   ;;  %v219_v3 = vld [vmem:[%s289_s1 + $0x10] sm:$0xff]  }
   0x2   :  { %196 = vmatpush3.bf16.msra.mxu0 %v217_v1  ;;  %v220_v4 = vld [vmem:[%s289_s1 + $0x18] sm:$0xff]   ;;  %v221_v5 = vld [vmem:[%s289_s1 + $0x20] sm:$0xff]   ;;  %v222_v6 = vld [vmem:[%s289_s1 + $0x28] sm:$0xff]  }
   0x3   :  { %197 = vmatprep.subr.bf16.mxu0 %v226_v0  ;;  %v223_v7 = vld [vmem:[%s289_s1 + $0x30] sm:$0xff]   ;;  %v224_v8 = vld [vmem:[%s289_s1 + $0x38] sm:$0xff]   ;;  %v225_v9 = vld [vmem:[%s290_s0] sm:$0xff]  }
   0x6   :  { %198 = vmatpush3.bf16.msra.mxu0 %v218_v2 }
   0x7   :  { %199 = vmatprep.subr.bf16.mxu0 %v226_v0 }
   0xa   :  { %200 = vmatpush3.bf16.msra.mxu0 %v219_v3 }
   0xb   :  { %201 = vmatprep.subr.bf16.mxu0 %v226_v0 }
   0xe   :  { %202 = vmatpush3.bf16.msra.mxu0 %v220_v4 }
   0xf   :  { %203 = vmatprep.subr.bf16.mxu0 %v226_v0 }
  0x12   :  { %204 = vmatpush3.bf16.msra.mxu0 %v221_v5 }
  0x13   :  { %205 = vmatprep.subr.bf16.mxu0 %v226_v0 }
  0x16   :  { %206 = vmatpush3.bf16.msra.mxu0 %v222_v6 }
  0x17   :  { %207 = vmatprep.subr.bf16.mxu0 %v226_v0 }
  0x1a   :  { %208 = vmatpush3.bf16.msra.mxu0 %v223_v7 }
  0x1b   :  { %209 = vmatprep.subr.bf16.mxu0 %v226_v0 }
  0x1e   :  { %210 = vmatpush3.bf16.msra.mxu0 %v224_v8 }
  0x21   :  { %212 = vmatmul.mubr.bf16.vlgmr.msra.gmra.mrb[0].mxu0 %v225_v9 }
  0xf4   :  { %v121_v10 = vpop.f32.mrb[0].mxu0 }
  0xf5   :  { %v213_v11 = vpop.f32.mrb[1].mxu0  ;;  %v146_v13 = vmul.f32 %v121_v10, %v121_v10 }
  0xf6   :  { %v124_v12 = vpop.f32.mrb[2].mxu0 }
  0xf7   :  { %v184_v14 = vpack.c.bf16 %v124_v12, %v121_v10  ;;  %v138_v15 = vadd.f32 %v124_v12, %v121_v10  ;;  %v147_v16 = vmul.f32 %v124_v12, %v124_v12  ;;  %v214_v17 = vpop.f32.mrb[3].mxu0 }
  0xf9   :  { %185 = vst [vmem:[%s291_s2] sm:$0xff] %v184_v14   ;;  %v139_v18 = vrot.slane %v138_v15, 4  ;;  %v148_v19 = vadd.f32 %v147_v16, %v146_v13 }
  0xfb   :  { %v140_v20 = vadd.f32 %v139_v18, %v138_v15  ;;  %v149_v21 = vrot.slane %v148_v19, 4 }
  0xfd   :  { %v141_v22 = vrot.slane %v140_v20, 2  ;;  %v150_v23 = vadd.f32 %v149_v21, %v148_v19 }
  0xff   :  { %v142_v24 = vadd.f32 %v141_v22, %v140_v20  ;;  %v151_v25 = vrot.slane %v150_v23, 2 }
 0x101   :  { %v143_v26 = vrot.slane %v142_v24, 1  ;;  %v152_v27 = vadd.f32 %v151_v25, %v150_v23 }
 0x103   :  { %v144_v28 = vadd.f32 %v143_v26, %v142_v24  ;;  %v153_v29 = vrot.slane %v152_v27, 1 }
 0x105   :  { %145 = vst [vmem:[%s292_s3] sm:$0x1] %v144_v28  ;;  %v154_v30 = vadd.f32 %v153_v29, %v152_v27 }
 0x107   :  { %155 = vst [vmem:[%s293_s4] sm:$0x1] %v154_v30 }

// kernel: mlp_forward_pallas.5
= control target key start
LH: loop header
LB: loop body
LE: loop exit
PB: predicated region body
PF: predicated region fallthrough
CT: control target
= control target key end

     0   :  { %v259_v0 = vmov 0   ;;  %vm192_vm0 = vcmask 130048   ;;  %vm243_vm1 = vcmask 122880   ;;  %s369_s3 = inlined_call_operand.vmem [shape: f32[128,1], index: 3, kind: input, shape index: {}]   ;;  %s370_s4 = inlined_call_operand.<no memory space> [shape: f32[1,1], index: 4, kind: input, shape index: {}]   ;;  %s371_s0 = inlined_call_operand.vmem [shape: bf16[16,128], index: 0, kind: input, shape index: {}]   ;;  %s372_s1 = inlined_call_operand.vmem [shape: f32[1,128], index: 1, kind: input, shape index: {}]   ;;  %s373_s2 = inlined_call_operand.vmem [shape: f32[1,128], index: 2, kind: input, shape index: {}]   ;;  %s374_s5 = inlined_call_operand.vmem [shape: f32[1,1,16], index: 5, kind: output, shape index: {}]  }
   0x1   :  { %258 = vset.pattern.permute.xlu1 %v259_v0  ;;  %v82_v1 = vld [vmem:[%s369_s3 + $0x10] sm:$0xff]  ;;  %257 = vset.pattern.permute.xlu0 %v259_v0  ;;  %v10_v2 = vstv %s370_s4  ;;  %v83_v3 = vld [vmem:[%s369_s3 + $0x18] sm:$0xff]  ;;  %v80_v4 = vld [vmem:[%s369_s3] sm:$0xff] }
   0x2   :  { %108 = vperm.xlu1 %258, %v82_v1   ;;  %11 = vst [vmem:[#allocation2] sm:$0x1] %v10_v2  ;;  %98 = vperm.xlu0 %257, %v80_v4   ;;  %v81_v5 = vld [vmem:[%s369_s3 + $0x8] sm:$0xff]  ;;  %v84_v7 = vld [vmem:[%s369_s3 + $0x20] sm:$0xff]  ;;  %v87_v8 = vld [vmem:[%s369_s3 + $0x38] sm:$0xff] }
   0x3   :  { %v85_v6 = vld [vmem:[%s369_s3 + $0x28] sm:$0xff]  ;;  %v86_v9 = vld [vmem:[%s369_s3 + $0x30] sm:$0xff]  ;;  %v88_v11 = vld [vmem:[%s369_s3 + $0x40] sm:$0xff] }
   0x4   :  { %v89_v10 = vld [vmem:[%s369_s3 + $0x48] sm:$0xff]  ;;  %v91_v12 = vld [vmem:[%s369_s3 + $0x58] sm:$0xff]  ;;  %v90_v13 = vld [vmem:[%s369_s3 + $0x50] sm:$0xff] }
   0x5   :  { %v93_v14 = vld [vmem:[%s369_s3 + $0x68] sm:$0xff]  ;;  %v92_v15 = vld [vmem:[%s369_s3 + $0x60] sm:$0xff]  ;;  %v94_v16 = vld [vmem:[%s369_s3 + $0x70] sm:$0xff] }
   0x6   :  { %113 = vperm.xlu1 %258, %v83_v3   ;;  %103 = vperm.xlu0 %257, %v81_v5   ;;  %v95_v17 = vld [vmem:[%s369_s3 + $0x78] sm:$0xff]  ;;  %v252_v19 = vld [vmem:[%s371_s0] sm:$0xff]  }
   0x7   :  { %v253_v20 = vunpack.c.l.bf16 %v252_v19  ;;  %v249_v21 = vld [vmem:[%s372_s1] ss:$0 sm:$0xff]  ;;  %v254_v22 = vunpack.c.h.bf16 %v252_v19 }
   0x8   :  { %v250_v24 = vld [vmem:[%s373_s2] ss:$0 sm:$0xff] }
   0x9   :  { %v230_v18 = vld [vmem:[#allocation2] sm:$0x1]  ;;  %v33_v23 = vmul.f32 %v253_v20, %v249_v21  ;;  %v34_v25 = vmul.f32 %v254_v22, %v249_v21 }
   0xa   :  { %123 = vperm.xlu1 %258, %v85_v6   ;;  %118 = vperm.xlu0 %257, %v84_v7  }
   0xb   :  { %v42_v26 = vadd.f32 %v250_v24, %v33_v23  ;;  %v43_v27 = vadd.f32 %v250_v24, %v34_v25 }
   0xd   :  { %v44_v28 = vmul.f32 0.01, %v42_v26  ;;  %v45_v30 = vmul.f32 0.01, %v43_v27 }
   0xe   :  { %133 = vperm.xlu1 %258, %v87_v8   ;;  %128 = vperm.xlu0 %257, %v86_v9  }
   0xf   :  { %v46_v29 = vmax.f32 %v42_v26, %v44_v28  ;;  %v47_v31 = vmax.f32 %v43_v27, %v45_v30 }
  0x12   :  { %143 = vperm.xlu1 %258, %v89_v10   ;;  %138 = vperm.xlu0 %257, %v88_v11  }
  0x16   :  { %153 = vperm.xlu1 %258, %v91_v12   ;;  %148 = vperm.xlu0 %257, %v90_v13  }
  0x1a   :  { %163 = vperm.xlu1 %258, %v93_v14   ;;  %158 = vperm.xlu0 %257, %v92_v15  }
  0x1e   :  { %168 = vperm.xlu0 %257, %v94_v16  }
  0x22   :  { %173 = vperm.xlu0 %257, %v95_v17  }
  0x26   :  { %233 = vperm.xlu0 %257, %v230_v18  }
  0x43   :  { %48 = vxpose.xlu1.b32.start [1/2] (short) %v46_v29, 128 }
  0x47   :  { %49 = vxpose.xlu1.b32.end [2/2] (short) %v47_v31, 128 }
  0x81   :  { %v109_v32 = vpop.permute.xlu1 %108  ;;  %v99_v42 = vpop.permute.xlu0 %98 }
  0x85   :  { %v114_v33 = vpop.permute.xlu1 %113  ;;  %v104_v45 = vpop.permute.xlu0 %103 }
  0x89   :  { %v124_v34 = vpop.permute.xlu1 %123  ;;  %v119_v47 = vpop.permute.xlu0 %118 }
  0x8d   :  { %v134_v35 = vpop.permute.xlu1 %133  ;;  %v129_v51 = vpop.permute.xlu0 %128 }
  0x91   :  { %v144_v36 = vpop.permute.xlu1 %143  ;;  %v139_v61 = vpop.permute.xlu0 %138 }
  0x95   :  { %v154_v37 = vpop.permute.xlu1 %153  ;;  %v149_v8 = vpop.permute.xlu0 %148 }
  0x99   :  { %v164_v38 = vpop.permute.xlu1 %163  ;;  %v159_v19 = vpop.permute.xlu0 %158 }
  0x9d   :  { %v169_v31 = vpop.permute.xlu0 %168 }
  0xc3   :  { %v64_v39 = vpop.trf.xlu1 }
  0xc4   :  { %v176_v52 = vmul.f32 %v99_v42, %v64_v39 }
  0xc6   :  { %v193_v57 = vsel %vm192_vm0, %v176_v52, 0.0 }
  0xc7   :  { %v65_v40 = vpop.trf.xlu1 }
  0xc8   :  { %v177_v50 = vmul.f32 %v104_v45, %v65_v40 }
  0xca   :  { %v194_v55 = vsel %vm192_vm0, %v177_v50, 0.0 }
  0xcb   :  { %v66_v41 = vpop.trf.xlu1  ;;  %v195_v60 = vadd.f32 %v194_v55, %v193_v57 }
  0xcc   :  { %v178_v53 = vmul.f32 %v109_v32, %v66_v41  ;;  %v174_v41 = vpop.permute.xlu0 %173 }
  0xce   :  { %v196_v58 = vsel %vm192_vm0, %v178_v53, 0.0 }
  0xcf   :  { %v67_v43 = vpop.trf.xlu1  ;;  %v197_v1 = vadd.f32 %v196_v58, %v195_v60 }
  0xd0   :  { %v179_v56 = vmul.f32 %v114_v33, %v67_v43 }
  0xd2   :  { %v198_v63 = vsel %vm192_vm0, %v179_v56, 0.0 }
  0xd3   :  { %v68_v44 = vpop.trf.xlu1  ;;  %v199_v4 = vadd.f32 %v198_v63, %v197_v1 }
  0xd4   :  { %v180_v59 = vmul.f32 %v119_v47, %v68_v44 }
  0xd6   :  { %v200_v2 = vsel %vm192_vm0, %v180_v59, 0.0 }
  0xd7   :  { %v69_v46 = vpop.trf.xlu1  ;;  %v201_v9 = vadd.f32 %v200_v2, %v199_v4 }
  0xd8   :  { %v181_v0 = vmul.f32 %v124_v34, %v69_v46 }
  0xda   :  { %v202_v6 = vsel %vm192_vm0, %v181_v0, 0.0 }
  0xdb   :  { %v70_v48 = vpop.trf.xlu1  ;;  %v203_v12 = vadd.f32 %v202_v6, %v201_v9 }
  0xdc   :  { %v182_v3 = vmul.f32 %v129_v51, %v70_v48 }
  0xde   :  { %v204_v10 = vsel %vm192_vm0, %v182_v3, 0.0 }
  0xdf   :  { %v71_v49 = vpop.trf.xlu1  ;;  %v205_v16 = vadd.f32 %v204_v10, %v203_v12 }
  0xe0   :  { %v183_v7 = vmul.f32 %v134_v35, %v71_v49 }
  0xe2   :  { %v206_v14 = vsel %vm192_vm0, %v183_v7, 0.0 }
  0xe3   :  { %v72_v54 = vpop.trf.xlu1  ;;  %v207_v20 = vadd.f32 %v206_v14, %v205_v16 }
  0xe4   :  { %v184_v11 = vmul.f32 %v139_v61, %v72_v54  ;;  %v234_v54 = vpop.permute.xlu0 %233 }
  0xe6   :  { %v208_v17 = vsel %vm192_vm0, %v184_v11, 0.0 }
  0xe7   :  { %v73_v62 = vpop.trf.xlu1  ;;  %v209_v24 = vadd.f32 %v208_v17, %v207_v20 }
  0xe8   :  { %v185_v15 = vmul.f32 %v144_v36, %v73_v62 }
  0xea   :  { %v210_v22 = vsel %vm192_vm0, %v185_v15, 0.0 }
  0xeb   :  { %v74_v5 = vpop.trf.xlu1  ;;  %v211_v27 = vadd.f32 %v210_v22, %v209_v24 }
  0xec   :  { %v186_v18 = vmul.f32 %v149_v8, %v74_v5 }
  0xee   :  { %v212_v25 = vsel %vm192_vm0, %v186_v18, 0.0 }
  0xef   :  { %v75_v13 = vpop.trf.xlu1  ;;  %v213_v32 = vadd.f32 %v212_v25, %v211_v27 }
  0xf0   :  { %v187_v23 = vmul.f32 %v154_v37, %v75_v13 }
  0xf2   :  { %v214_v29 = vsel %vm192_vm0, %v187_v23, 0.0 }
  0xf3   :  { %v76_v21 = vpop.trf.xlu1  ;;  %v215_v34 = vadd.f32 %v214_v29, %v213_v32 }
  0xf4   :  { %v188_v26 = vmul.f32 %v159_v19, %v76_v21 }
  0xf6   :  { %v216_v33 = vsel %vm192_vm0, %v188_v26, 0.0 }
  0xf7   :  { %v77_v28 = vpop.trf.xlu1  ;;  %v217_v40 = vadd.f32 %v216_v33, %v215_v34 }
  0xf8   :  { %v189_v30 = vmul.f32 %v164_v38, %v77_v28  ;;  %v236_v38 = vlaneseq }
  0xfa   :  { %v218_v36 = vsel %vm192_vm0, %v189_v30, 0.0  ;;  %v237_v49 = vshrl.u32 %v236_v38, 7 }
  0xfb   :  { %v78_v35 = vpop.trf.xlu1  ;;  %v219_v42 = vadd.f32 %v218_v36, %v217_v40 }
  0xfc   :  { %v190_v39 = vmul.f32 %v169_v31, %v78_v35  ;;  %v238_v52 = vsub.s32 0, %v237_v49 }
  0xfe   :  { %v220_v37 = vsel %vm192_vm0, %v190_v39, 0.0  ;;  %v239_v56 = vrot.slane %v234_v54, %v238_v52 }
  0xff   :  { %v79_v43 = vpop.trf.xlu1  ;;  %v221_v45 = vadd.f32 %v220_v37, %v219_v42 }
 0x100   :  { %v191_v44 = vmul.f32 %v174_v41, %v79_v43 }
 0x102   :  { %v222_v46 = vsel %vm192_vm0, %v191_v44, 0.0 }
 0x103   :  { %v223_v47 = vadd.f32 %v222_v46, %v221_v45 }
 0x105   :  { %v224_v48 = vrot.slane %v223_v47, 4 }
 0x107   :  { %v225_v50 = vadd.f32 %v224_v48, %v223_v47 }
 0x109   :  { %v226_v51 = vrot.slane %v225_v50, 2 }
 0x10b   :  { %v227_v53 = vadd.f32 %v226_v51, %v225_v50 }
 0x10d   :  { %v228_v55 = vrot.slane %v227_v53, 1 }
 0x10f   :  { %v229_v57 = vadd.f32 %v228_v55, %v227_v53 }
 0x111   :  { %v240_v58 = vadd.f32 %v239_v56, %v229_v57 }
 0x113   :  { %v241_v59 = vmul.f32 0.01, %v240_v58 }
 0x115   :  { %v242_v60 = vmax.f32 %v240_v58, %v241_v59 }
 0x117   :  { %244 = vst.msk [vmem:[%s374_s5] sm:$0x1] %vm243_vm1, %v242_v60 }

</bundles_post_ra>
